<compile_context>
chip_gen: v7x
topology: tpu7x:2x2x1
jax: 0.10.0
libtpu: 0.0.40
codegen_flags: <defaults>
</compile_context>

<pallas_src>
import functools

import jax
import jax.numpy as jnp
import numpy as np
from jax.experimental import pallas as pl
from jax.experimental.pallas import tpu as pltpu

_LANE = 128
_SMOOTH = 1e-5


def _cdiv(a, b):
    return -(-a // b)


def _pad_up(x, m):
    return _cdiv(x, m) * m


def _dice_sums_kernel(score_ref, target_ref, out_ref, acc_ref, *,
                      n_classes, n_valid, tile_px, fuse_softmax, mask_tail):
    """Grid = (batch, pixel_tile).

    score_ref : (1, C, tile_rows, 128) f32   logits (fuse_softmax) or probs
    target_ref: (1, tile_rows, 128)    int   class labels (pad = -1)
    out_ref   : (1, 3, C)              f32   per-image [intersect, z_sum, y_sum]
    acc_ref   : (3, C, 8, 128)         f32   VMEM vector accumulators
    """
    t = pl.program_id(1)
    n_tiles = pl.num_programs(1)

    @pl.when(t == 0)
    def _():
        acc_ref[...] = jnp.zeros_like(acc_ref)

    x = score_ref[0]                                   # (C, tile_rows, 128)
    tile_rows = x.shape[1]

    if fuse_softmax:
        m = jnp.max(x, axis=0, keepdims=True)
        e = jnp.exp(x - m)
        x = e / jnp.sum(e, axis=0, keepdims=True)
        if mask_tail:
            # softmax turns the zero-padded pixels into 1/C -> mask them out
            # (only the z_sum / intersect terms need it; label pad = -1 already
            #  kills the one-hot terms).
            idx = (t * tile_px
                   + jax.lax.broadcasted_iota(jnp.int32, (tile_rows, _LANE), 0) * _LANE
                   + jax.lax.broadcasted_iota(jnp.int32, (tile_rows, _LANE), 1))
            x = x * (idx < n_valid).astype(jnp.float32)

    tgt = target_ref[0].astype(jnp.int32)              # (tile_rows, 128)

    nv = tile_rows // 8

    def vsum(a):
        # (tile_rows, 128) -> (8, 128): pure per-vreg VPU adds, no cross-lane
        # reduction in the hot loop.
        return jnp.sum(a.reshape(nv, 8, _LANE), axis=0)

    for c in range(n_classes):
        sc = x[c]                                      # (tile_rows, 128)
        onehot = (tgt == c).astype(jnp.float32)        # pad label -1 never matches
        acc_ref[0, c] += vsum(sc * onehot)             # intersect
        acc_ref[1, c] += vsum(sc * sc)                 # z_sum
        acc_ref[2, c] += vsum(onehot)                  # y_sum

    @pl.when(t == n_tiles - 1)
    def _():
        # one cross-lane reduction per image, in the epilogue only
        red = jnp.sum(jnp.sum(acc_ref[...], axis=-1), axis=-1)   # (3, C)
        out_ref[0] = red


def dice_loss(inputs, target, n_classes, weight=None, softmax=False):
    """Pallas implementation of DiceLoss.forward.

    inputs: (B, C, H, W) float (probabilities, or logits if softmax=True)
    target: (B, H, W) integer class labels in [0, n_classes)
    Returns scalar float32 loss = weighted mean of per-class dice losses.
    """
    inputs = jnp.asarray(inputs, jnp.float32)
    B, C, H, W = inputs.shape
    assert C == n_classes, f"predict C={C} & n_classes={n_classes} do not match"
    assert target.shape == (B, H, W)
    if weight is None:
        weight = jnp.ones((n_classes,), jnp.float32)
    else:
        weight = jnp.asarray(weight, jnp.float32)

    # ---- pixel-axis tiling (no transpose; minimal zero-pad of the pixel axis)
    P = H * W
    rows = _pad_up(_cdiv(P, _LANE), 32)           # 32-row granularity (int8 labels)
    # keep 2 buffers x (score + label) stream under ~12 MiB scoped VMEM
    # (safe on v5e 16 MiB default, v6e, and v7x's 64 MiB physical VMEM)
    cap = (12 * 1024 * 1024) // (2 * _LANE * (4 * C + 1))
    cap = max(32, min(1024, (cap // 32) * 32))
    n_tiles = _cdiv(rows, cap)
    tile_rows = _pad_up(_cdiv(rows, n_tiles), 32)
    rows_pad = n_tiles * tile_rows
    px_pad = rows_pad * _LANE

    # (B, C, H, W) -> (B, C, P) is a free reshape (no relayout); pad pixel axis.
    score = inputs.reshape(B, C, P)
    score = jnp.pad(score, ((0, 0), (0, 0), (0, px_pad - P)))
    score = score.reshape(B, C, rows_pad, _LANE)

    tgt_dtype = jnp.int8 if n_classes <= 127 else jnp.int32
    tgt = target.reshape(B, P).astype(tgt_dtype)
    tgt = jnp.pad(tgt, ((0, 0), (0, px_pad - P)), constant_values=-1)
    tgt = tgt.reshape(B, rows_pad, _LANE)

    kernel = functools.partial(
        _dice_sums_kernel, n_classes=n_classes, n_valid=P,
        tile_px=tile_rows * _LANE, fuse_softmax=bool(softmax),
        mask_tail=(px_pad != P))

    sums = pl.pallas_call(
        kernel,
        out_shape=jax.ShapeDtypeStruct((B, 3, n_classes), jnp.float32),
        grid_spec=pltpu.PrefetchScalarGridSpec(
            num_scalar_prefetch=0,
            grid=(B, n_tiles),
            in_specs=[
                # all C class planes of one pixel tile per step
                pl.BlockSpec((1, C, tile_rows, _LANE), lambda b, t: (b, 0, t, 0)),
                # label tile, read exactly once
                pl.BlockSpec((1, tile_rows, _LANE), lambda b, t: (b, t, 0)),
            ],
            out_specs=pl.BlockSpec((1, 3, n_classes), lambda b, t: (b, 0, 0)),
            scratch_shapes=[pltpu.VMEM((3, n_classes, 8, _LANE), jnp.float32)],
        ),
        compiler_params=pltpu.CompilerParams(
            dimension_semantics=("parallel", "arbitrary"),
            vmem_limit_bytes=32 * 1024 * 1024),
    )(score, tgt)

    # tiny epilogue in plain JAX: sum over batch, dice formula, weighted mean
    per_class = jnp.sum(sums, axis=0)                  # (3, C)
    intersect, z_sum, y_sum = per_class[0], per_class[1], per_class[2]
    dice = 1.0 - (2.0 * intersect + _SMOOTH) / (z_sum + y_sum + _SMOOTH)
    return jnp.sum(dice * weight) / n_classes


def _dice_loss_reference(inputs, target, n_classes, weight=None, softmax=False):
    """Pure-JAX reference mirroring the PyTorch module."""
    if softmax:
        inputs = jax.nn.softmax(inputs, axis=1)
    if weight is None:
        weight = [1.0] * n_classes
    onehot = (target[:, None, :, :] == jnp.arange(n_classes)[None, :, None, None]
              ).astype(jnp.float32)
    loss = 0.0
    for i in range(n_classes):
        score = inputs[:, i].astype(jnp.float32)
        tgt = onehot[:, i]
        intersect = jnp.sum(score * tgt)
        y_sum = jnp.sum(tgt * tgt)
        z_sum = jnp.sum(score * score)
        dice = 1.0 - (2.0 * intersect + _SMOOTH) / (z_sum + y_sum + _SMOOTH)
        loss = loss + dice * weight[i]
    return loss / n_classes


if __name__ == "__main__":
    key = jax.random.PRNGKey(0)
    k1, k2 = jax.random.split(key)

    B, C, H, W = 2, 4, 16, 16
    logits = jax.random.normal(k1, (B, C, H, W), dtype=jnp.float32)
    target = jax.random.randint(k2, (B, H, W), 0, C, dtype=jnp.int32)

    # fused-softmax path
    loss = jax.block_until_ready(dice_loss(logits, target, n_classes=C, softmax=True))
    ref = _dice_loss_reference(logits, target, n_classes=C, softmax=True)
    np.testing.assert_allclose(np.asarray(loss), np.asarray(ref), rtol=2e-5, atol=1e-6)

    # probability inputs + per-class weights path
    probs = jax.nn.softmax(logits, axis=1)
    w = [0.5, 1.0, 2.0, 1.5]
    loss_w = jax.block_until_ready(
        dice_loss(probs, target, n_classes=C, weight=w, softmax=False))
    ref_w = _dice_loss_reference(probs, target, n_classes=C, weight=w, softmax=False)
    np.testing.assert_allclose(np.asarray(loss_w), np.asarray(ref_w), rtol=2e-5, atol=1e-6)

    print("KERNEL_OK")
</pallas_src>

<mosaic_0001>
module attributes {stable_mosaic.version = 11 : i64} {
  func.func @_dice_sums_kernel(%arg0: i32, %arg1: i32, %arg2: memref<1x4x32x128xf32, #tpu.memory_space<vmem>>, %arg3: memref<1x32x128xi8, #tpu.memory_space<vmem>>, %arg4: memref<1x3x4xf32, #tpu.memory_space<vmem>>, %arg5: memref<3x4x8x128xf32, #tpu.memory_space<vmem>>) attributes {dimension_semantics = [#tpu.dimension_semantics<parallel>, #tpu.dimension_semantics<arbitrary>], iteration_bounds = array<i64: 2, 1>, scalar_prefetch = 0 : i64, scratch_operands = 1 : i64, tpu.core_type = #tpu.core_type<tc>, window_params = [{transform_indices = @transform_0, window_bounds = array<i64: 1, 4, 32, 128>}, {transform_indices = @transform_1, window_bounds = array<i64: 1, 32, 128>}, {transform_indices = @transform_2, window_bounds = array<i64: 1, 3, 4>}]} {
    %c0_i32 = arith.constant 0 : i32
    %0 = arith.cmpi eq, %arg1, %c0_i32 : i32
    %1 = arith.extui %0 : i1 to i32
    %c0_i32_0 = arith.constant 0 : i32
    %2 = arith.cmpi ne, %1, %c0_i32_0 : i32
    scf.if %2 {
      %cst_116 = arith.constant 0.000000e+00 : f32
      %163 = vector.broadcast %cst_116 : f32 to vector<3x4x8x128xf32>
      %c0_117 = arith.constant 0 : index
      %c0_118 = arith.constant 0 : index
      %c0_119 = arith.constant 0 : index
      %c0_120 = arith.constant 0 : index
      %164 = vector.load %arg5[%c0_117, %c0_118, %c0_119, %c0_120] : memref<3x4x8x128xf32, #tpu.memory_space<vmem>>, vector<3x4x8x128xf32>
      tpu.vector_store %arg5[%c0_117, %c0_118, %c0_119, %c0_120], %163 {strides = array<i32>} : memref<3x4x8x128xf32, #tpu.memory_space<vmem>>, vector<3x4x8x128xf32>,
    } else {
    }
    %c0 = arith.constant 0 : index
    %c0_1 = arith.constant 0 : index
    %c0_2 = arith.constant 0 : index
    %c0_3 = arith.constant 0 : index
    %3 = vector.load %arg2[%c0, %c0_1, %c0_2, %c0_3] : memref<1x4x32x128xf32, #tpu.memory_space<vmem>>, vector<1x4x32x128xf32>
    %4 = vector.shape_cast %3 : vector<1x4x32x128xf32> to vector<4x32x128xf32>
    %cst = arith.constant dense<0xFF800000> : vector<32x128xf32>
    %5 = vector.multi_reduction <maximumf>, %4, %cst [0] : vector<4x32x128xf32> to vector<32x128xf32>
    %6 = vector.shape_cast %5 : vector<32x128xf32> to vector<1x32x128xf32>
    %7 = vector.broadcast %6 : vector<1x32x128xf32> to vector<4x32x128xf32>
    %8 = arith.subf %4, %7 : vector<4x32x128xf32>
    %9 = math.exp %8 : vector<4x32x128xf32>
    %cst_4 = arith.constant dense<0.000000e+00> : vector<32x128xf32>
    %10 = vector.multi_reduction <add>, %9, %cst_4 [0] : vector<4x32x128xf32> to vector<32x128xf32>
    %11 = vector.shape_cast %10 : vector<32x128xf32> to vector<1x32x128xf32>
    %12 = vector.broadcast %11 : vector<1x32x128xf32> to vector<4x32x128xf32>
    %13 = arith.divf %9, %12 : vector<4x32x128xf32>
    %c4096_i32 = arith.constant 4096 : i32
    %14 = arith.muli %arg1, %c4096_i32 : i32
    %15 = tpu.iota {dimensions = array<i32: 0>} : vector<32x128xi32>
    %c128_i32 = arith.constant 128 : i32
    %16 = vector.broadcast %c128_i32 : i32 to vector<32x128xi32>
    %17 = arith.muli %15, %16 : vector<32x128xi32>
    %18 = vector.broadcast %14 : i32 to vector<32x128xi32>
    %19 = arith.addi %18, %17 : vector<32x128xi32>
    %20 = tpu.iota {dimensions = array<i32: 1>} : vector<32x128xi32>
    %21 = arith.addi %19, %20 : vector<32x128xi32>
    %c256_i32 = arith.constant 256 : i32
    %22 = vector.broadcast %c256_i32 : i32 to vector<32x128xi32>
    %23 = arith.cmpi slt, %21, %22 : vector<32x128xi32>
    %24 = arith.extui %23 : vector<32x128xi1> to vector<32x128xi32>
    %25 = arith.sitofp %24 : vector<32x128xi32> to vector<32x128xf32>
    %26 = vector.shape_cast %25 : vector<32x128xf32> to vector<1x32x128xf32>
    %27 = vector.broadcast %26 : vector<1x32x128xf32> to vector<4x32x128xf32>
    %28 = arith.mulf %13, %27 : vector<4x32x128xf32>
    %c0_5 = arith.constant 0 : index
    %c0_6 = arith.constant 0 : index
    %c0_7 = arith.constant 0 : index
    %29 = vector.load %arg3[%c0_5, %c0_6, %c0_7] : memref<1x32x128xi8, #tpu.memory_space<vmem>>, vector<1x32x128xi8>
    %30 = vector.shape_cast %29 : vector<1x32x128xi8> to vector<32x128xi8>
    %31 = arith.extsi %30 : vector<32x128xi8> to vector<32x128xi32>
    %32 = vector.extract_strided_slice %28 {offsets = [0, 0, 0], sizes = [1, 32, 128], strides = [1, 1, 1]} : vector<4x32x128xf32> to vector<1x32x128xf32>
    %33 = vector.shape_cast %32 : vector<1x32x128xf32> to vector<32x128xf32>
    %c0_i32_8 = arith.constant 0 : i32
    %34 = vector.broadcast %c0_i32_8 : i32 to vector<32x128xi32>
    %35 = arith.cmpi eq, %31, %34 : vector<32x128xi32>
    %36 = arith.extui %35 : vector<32x128xi1> to vector<32x128xi32>
    %37 = arith.sitofp %36 : vector<32x128xi32> to vector<32x128xf32>
    %c0_9 = arith.constant 0 : index
    %c0_10 = arith.constant 0 : index
    %c0_11 = arith.constant 0 : index
    %c0_12 = arith.constant 0 : index
    %38 = vector.load %arg5[%c0_9, %c0_10, %c0_11, %c0_12] : memref<3x4x8x128xf32, #tpu.memory_space<vmem>>, vector<1x1x8x128xf32>
    %39 = vector.shape_cast %38 : vector<1x1x8x128xf32> to vector<8x128xf32>
    %40 = arith.mulf %33, %37 : vector<32x128xf32>
    %41 = vector.shape_cast %40 : vector<32x128xf32> to vector<4x8x128xf32>
    %cst_13 = arith.constant dense<0.000000e+00> : vector<8x128xf32>
    %42 = vector.multi_reduction <add>, %41, %cst_13 [0] : vector<4x8x128xf32> to vector<8x128xf32>
    %43 = arith.addf %39, %42 : vector<8x128xf32>
    %c0_14 = arith.constant 0 : index
    %c0_15 = arith.constant 0 : index
    %c0_16 = arith.constant 0 : index
    %c0_17 = arith.constant 0 : index
    %44 = vector.load %arg5[%c0_14, %c0_15, %c0_16, %c0_17] : memref<3x4x8x128xf32, #tpu.memory_space<vmem>>, vector<1x1x8x128xf32>
    %45 = vector.shape_cast %44 : vector<1x1x8x128xf32> to vector<8x128xf32>
    %46 = vector.shape_cast %43 : vector<8x128xf32> to vector<1x1x8x128xf32>
    tpu.vector_store %arg5[%c0_14, %c0_15, %c0_16, %c0_17], %46 {strides = array<i32>} : memref<3x4x8x128xf32, #tpu.memory_space<vmem>>, vector<1x1x8x128xf32>,
    %c1 = arith.constant 1 : index
    %c0_18 = arith.constant 0 : index
    %c0_19 = arith.constant 0 : index
    %c0_20 = arith.constant 0 : index
    %47 = vector.load %arg5[%c1, %c0_18, %c0_19, %c0_20] : memref<3x4x8x128xf32, #tpu.memory_space<vmem>>, vector<1x1x8x128xf32>
    %48 = vector.shape_cast %47 : vector<1x1x8x128xf32> to vector<8x128xf32>
    %49 = arith.mulf %33, %33 : vector<32x128xf32>
    %50 = vector.shape_cast %49 : vector<32x128xf32> to vector<4x8x128xf32>
    %cst_21 = arith.constant dense<0.000000e+00> : vector<8x128xf32>
    %51 = vector.multi_reduction <add>, %50, %cst_21 [0] : vector<4x8x128xf32> to vector<8x128xf32>
    %52 = arith.addf %48, %51 : vector<8x128xf32>
    %c1_22 = arith.constant 1 : index
    %c0_23 = arith.constant 0 : index
    %c0_24 = arith.constant 0 : index
    %c0_25 = arith.constant 0 : index
    %53 = vector.load %arg5[%c1_22, %c0_23, %c0_24, %c0_25] : memref<3x4x8x128xf32, #tpu.memory_space<vmem>>, vector<1x1x8x128xf32>
    %54 = vector.shape_cast %53 : vector<1x1x8x128xf32> to vector<8x128xf32>
    %55 = vector.shape_cast %52 : vector<8x128xf32> to vector<1x1x8x128xf32>
    tpu.vector_store %arg5[%c1_22, %c0_23, %c0_24, %c0_25], %55 {strides = array<i32>} : memref<3x4x8x128xf32, #tpu.memory_space<vmem>>, vector<1x1x8x128xf32>,
    %c2 = arith.constant 2 : index
    %c0_26 = arith.constant 0 : index
    %c0_27 = arith.constant 0 : index
    %c0_28 = arith.constant 0 : index
    %56 = vector.load %arg5[%c2, %c0_26, %c0_27, %c0_28] : memref<3x4x8x128xf32, #tpu.memory_space<vmem>>, vector<1x1x8x128xf32>
    %57 = vector.shape_cast %56 : vector<1x1x8x128xf32> to vector<8x128xf32>
    %58 = vector.shape_cast %37 : vector<32x128xf32> to vector<4x8x128xf32>
    %cst_29 = arith.constant dense<0.000000e+00> : vector<8x128xf32>
    %59 = vector.multi_reduction <add>, %58, %cst_29 [0] : vector<4x8x128xf32> to vector<8x128xf32>
    %60 = arith.addf %57, %59 : vector<8x128xf32>
    %c2_30 = arith.constant 2 : index
    %c0_31 = arith.constant 0 : index
    %c0_32 = arith.constant 0 : index
    %c0_33 = arith.constant 0 : index
    %61 = vector.load %arg5[%c2_30, %c0_31, %c0_32, %c0_33] : memref<3x4x8x128xf32, #tpu.memory_space<vmem>>, vector<1x1x8x128xf32>
    %62 = vector.shape_cast %61 : vector<1x1x8x128xf32> to vector<8x128xf32>
    %63 = vector.shape_cast %60 : vector<8x128xf32> to vector<1x1x8x128xf32>
    tpu.vector_store %arg5[%c2_30, %c0_31, %c0_32, %c0_33], %63 {strides = array<i32>} : memref<3x4x8x128xf32, #tpu.memory_space<vmem>>, vector<1x1x8x128xf32>,
    %64 = vector.extract_strided_slice %28 {offsets = [1, 0, 0], sizes = [1, 32, 128], strides = [1, 1, 1]} : vector<4x32x128xf32> to vector<1x32x128xf32>
    %65 = vector.shape_cast %64 : vector<1x32x128xf32> to vector<32x128xf32>
    %c1_i32 = arith.constant 1 : i32
    %66 = vector.broadcast %c1_i32 : i32 to vector<32x128xi32>
    %67 = arith.cmpi eq, %31, %66 : vector<32x128xi32>
    %68 = arith.extui %67 : vector<32x128xi1> to vector<32x128xi32>
    %69 = arith.sitofp %68 : vector<32x128xi32> to vector<32x128xf32>
    %c0_34 = arith.constant 0 : index
    %c1_35 = arith.constant 1 : index
    %c0_36 = arith.constant 0 : index
    %c0_37 = arith.constant 0 : index
    %70 = vector.load %arg5[%c0_34, %c1_35, %c0_36, %c0_37] : memref<3x4x8x128xf32, #tpu.memory_space<vmem>>, vector<1x1x8x128xf32>
    %71 = vector.shape_cast %70 : vector<1x1x8x128xf32> to vector<8x128xf32>
    %72 = arith.mulf %65, %69 : vector<32x128xf32>
    %73 = vector.shape_cast %72 : vector<32x128xf32> to vector<4x8x128xf32>
    %cst_38 = arith.constant dense<0.000000e+00> : vector<8x128xf32>
    %74 = vector.multi_reduction <add>, %73, %cst_38 [0] : vector<4x8x128xf32> to vector<8x128xf32>
    %75 = arith.addf %71, %74 : vector<8x128xf32>
    %c0_39 = arith.constant 0 : index
    %c1_40 = arith.constant 1 : index
    %c0_41 = arith.constant 0 : index
    %c0_42 = arith.constant 0 : index
    %76 = vector.load %arg5[%c0_39, %c1_40, %c0_41, %c0_42] : memref<3x4x8x128xf32, #tpu.memory_space<vmem>>, vector<1x1x8x128xf32>
    %77 = vector.shape_cast %76 : vector<1x1x8x128xf32> to vector<8x128xf32>
    %78 = vector.shape_cast %75 : vector<8x128xf32> to vector<1x1x8x128xf32>
    tpu.vector_store %arg5[%c0_39, %c1_40, %c0_41, %c0_42], %78 {strides = array<i32>} : memref<3x4x8x128xf32, #tpu.memory_space<vmem>>, vector<1x1x8x128xf32>,
    %c1_43 = arith.constant 1 : index
    %c1_44 = arith.constant 1 : index
    %c0_45 = arith.constant 0 : index
    %c0_46 = arith.constant 0 : index
    %79 = vector.load %arg5[%c1_43, %c1_44, %c0_45, %c0_46] : memref<3x4x8x128xf32, #tpu.memory_space<vmem>>, vector<1x1x8x128xf32>
    %80 = vector.shape_cast %79 : vector<1x1x8x128xf32> to vector<8x128xf32>
    %81 = arith.mulf %65, %65 : vector<32x128xf32>
    %82 = vector.shape_cast %81 : vector<32x128xf32> to vector<4x8x128xf32>
    %cst_47 = arith.constant dense<0.000000e+00> : vector<8x128xf32>
    %83 = vector.multi_reduction <add>, %82, %cst_47 [0] : vector<4x8x128xf32> to vector<8x128xf32>
    %84 = arith.addf %80, %83 : vector<8x128xf32>
    %c1_48 = arith.constant 1 : index
    %c1_49 = arith.constant 1 : index
    %c0_50 = arith.constant 0 : index
    %c0_51 = arith.constant 0 : index
    %85 = vector.load %arg5[%c1_48, %c1_49, %c0_50, %c0_51] : memref<3x4x8x128xf32, #tpu.memory_space<vmem>>, vector<1x1x8x128xf32>
    %86 = vector.shape_cast %85 : vector<1x1x8x128xf32> to vector<8x128xf32>
    %87 = vector.shape_cast %84 : vector<8x128xf32> to vector<1x1x8x128xf32>
    tpu.vector_store %arg5[%c1_48, %c1_49, %c0_50, %c0_51], %87 {strides = array<i32>} : memref<3x4x8x128xf32, #tpu.memory_space<vmem>>, vector<1x1x8x128xf32>,
    %c2_52 = arith.constant 2 : index
    %c1_53 = arith.constant 1 : index
    %c0_54 = arith.constant 0 : index
    %c0_55 = arith.constant 0 : index
    %88 = vector.load %arg5[%c2_52, %c1_53, %c0_54, %c0_55] : memref<3x4x8x128xf32, #tpu.memory_space<vmem>>, vector<1x1x8x128xf32>
    %89 = vector.shape_cast %88 : vector<1x1x8x128xf32> to vector<8x128xf32>
    %90 = vector.shape_cast %69 : vector<32x128xf32> to vector<4x8x128xf32>
    %cst_56 = arith.constant dense<0.000000e+00> : vector<8x128xf32>
    %91 = vector.multi_reduction <add>, %90, %cst_56 [0] : vector<4x8x128xf32> to vector<8x128xf32>
    %92 = arith.addf %89, %91 : vector<8x128xf32>
    %c2_57 = arith.constant 2 : index
    %c1_58 = arith.constant 1 : index
    %c0_59 = arith.constant 0 : index
    %c0_60 = arith.constant 0 : index
    %93 = vector.load %arg5[%c2_57, %c1_58, %c0_59, %c0_60] : memref<3x4x8x128xf32, #tpu.memory_space<vmem>>, vector<1x1x8x128xf32>
    %94 = vector.shape_cast %93 : vector<1x1x8x128xf32> to vector<8x128xf32>
    %95 = vector.shape_cast %92 : vector<8x128xf32> to vector<1x1x8x128xf32>
    tpu.vector_store %arg5[%c2_57, %c1_58, %c0_59, %c0_60], %95 {strides = array<i32>} : memref<3x4x8x128xf32, #tpu.memory_space<vmem>>, vector<1x1x8x128xf32>,
    %96 = vector.extract_strided_slice %28 {offsets = [2, 0, 0], sizes = [1, 32, 128], strides = [1, 1, 1]} : vector<4x32x128xf32> to vector<1x32x128xf32>
    %97 = vector.shape_cast %96 : vector<1x32x128xf32> to vector<32x128xf32>
    %c2_i32 = arith.constant 2 : i32
    %98 = vector.broadcast %c2_i32 : i32 to vector<32x128xi32>
    %99 = arith.cmpi eq, %31, %98 : vector<32x128xi32>
    %100 = arith.extui %99 : vector<32x128xi1> to vector<32x128xi32>
    %101 = arith.sitofp %100 : vector<32x128xi32> to vector<32x128xf32>
    %c0_61 = arith.constant 0 : index
    %c2_62 = arith.constant 2 : index
    %c0_63 = arith.constant 0 : index
    %c0_64 = arith.constant 0 : index
    %102 = vector.load %arg5[%c0_61, %c2_62, %c0_63, %c0_64] : memref<3x4x8x128xf32, #tpu.memory_space<vmem>>, vector<1x1x8x128xf32>
    %103 = vector.shape_cast %102 : vector<1x1x8x128xf32> to vector<8x128xf32>
    %104 = arith.mulf %97, %101 : vector<32x128xf32>
    %105 = vector.shape_cast %104 : vector<32x128xf32> to vector<4x8x128xf32>
    %cst_65 = arith.constant dense<0.000000e+00> : vector<8x128xf32>
    %106 = vector.multi_reduction <add>, %105, %cst_65 [0] : vector<4x8x128xf32> to vector<8x128xf32>
    %107 = arith.addf %103, %106 : vector<8x128xf32>
    %c0_66 = arith.constant 0 : index
    %c2_67 = arith.constant 2 : index
    %c0_68 = arith.constant 0 : index
    %c0_69 = arith.constant 0 : index
    %108 = vector.load %arg5[%c0_66, %c2_67, %c0_68, %c0_69] : memref<3x4x8x128xf32, #tpu.memory_space<vmem>>, vector<1x1x8x128xf32>
    %109 = vector.shape_cast %108 : vector<1x1x8x128xf32> to vector<8x128xf32>
    %110 = vector.shape_cast %107 : vector<8x128xf32> to vector<1x1x8x128xf32>
    tpu.vector_store %arg5[%c0_66, %c2_67, %c0_68, %c0_69], %110 {strides = array<i32>} : memref<3x4x8x128xf32, #tpu.memory_space<vmem>>, vector<1x1x8x128xf32>,
    %c1_70 = arith.constant 1 : index
    %c2_71 = arith.constant 2 : index
    %c0_72 = arith.constant 0 : index
    %c0_73 = arith.constant 0 : index
    %111 = vector.load %arg5[%c1_70, %c2_71, %c0_72, %c0_73] : memref<3x4x8x128xf32, #tpu.memory_space<vmem>>, vector<1x1x8x128xf32>
    %112 = vector.shape_cast %111 : vector<1x1x8x128xf32> to vector<8x128xf32>
    %113 = arith.mulf %97, %97 : vector<32x128xf32>
    %114 = vector.shape_cast %113 : vector<32x128xf32> to vector<4x8x128xf32>
    %cst_74 = arith.constant dense<0.000000e+00> : vector<8x128xf32>
    %115 = vector.multi_reduction <add>, %114, %cst_74 [0] : vector<4x8x128xf32> to vector<8x128xf32>
    %116 = arith.addf %112, %115 : vector<8x128xf32>
    %c1_75 = arith.constant 1 : index
    %c2_76 = arith.constant 2 : index
    %c0_77 = arith.constant 0 : index
    %c0_78 = arith.constant 0 : index
    %117 = vector.load %arg5[%c1_75, %c2_76, %c0_77, %c0_78] : memref<3x4x8x128xf32, #tpu.memory_space<vmem>>, vector<1x1x8x128xf32>
    %118 = vector.shape_cast %117 : vector<1x1x8x128xf32> to vector<8x128xf32>
    %119 = vector.shape_cast %116 : vector<8x128xf32> to vector<1x1x8x128xf32>
    tpu.vector_store %arg5[%c1_75, %c2_76, %c0_77, %c0_78], %119 {strides = array<i32>} : memref<3x4x8x128xf32, #tpu.memory_space<vmem>>, vector<1x1x8x128xf32>,
    %c2_79 = arith.constant 2 : index
    %c2_80 = arith.constant 2 : index
    %c0_81 = arith.constant 0 : index
    %c0_82 = arith.constant 0 : index
    %120 = vector.load %arg5[%c2_79, %c2_80, %c0_81, %c0_82] : memref<3x4x8x128xf32, #tpu.memory_space<vmem>>, vector<1x1x8x128xf32>
    %121 = vector.shape_cast %120 : vector<1x1x8x128xf32> to vector<8x128xf32>
    %122 = vector.shape_cast %101 : vector<32x128xf32> to vector<4x8x128xf32>
    %cst_83 = arith.constant dense<0.000000e+00> : vector<8x128xf32>
    %123 = vector.multi_reduction <add>, %122, %cst_83 [0] : vector<4x8x128xf32> to vector<8x128xf32>
    %124 = arith.addf %121, %123 : vector<8x128xf32>
    %c2_84 = arith.constant 2 : index
    %c2_85 = arith.constant 2 : index
    %c0_86 = arith.constant 0 : index
    %c0_87 = arith.constant 0 : index
    %125 = vector.load %arg5[%c2_84, %c2_85, %c0_86, %c0_87] : memref<3x4x8x128xf32, #tpu.memory_space<vmem>>, vector<1x1x8x128xf32>
    %126 = vector.shape_cast %125 : vector<1x1x8x128xf32> to vector<8x128xf32>
    %127 = vector.shape_cast %124 : vector<8x128xf32> to vector<1x1x8x128xf32>
    tpu.vector_store %arg5[%c2_84, %c2_85, %c0_86, %c0_87], %127 {strides = array<i32>} : memref<3x4x8x128xf32, #tpu.memory_space<vmem>>, vector<1x1x8x128xf32>,
    %128 = vector.extract_strided_slice %28 {offsets = [3, 0, 0], sizes = [1, 32, 128], strides = [1, 1, 1]} : vector<4x32x128xf32> to vector<1x32x128xf32>
    %129 = vector.shape_cast %128 : vector<1x32x128xf32> to vector<32x128xf32>
    %c3_i32 = arith.constant 3 : i32
    %130 = vector.broadcast %c3_i32 : i32 to vector<32x128xi32>
    %131 = arith.cmpi eq, %31, %130 : vector<32x128xi32>
    %132 = arith.extui %131 : vector<32x128xi1> to vector<32x128xi32>
    %133 = arith.sitofp %132 : vector<32x128xi32> to vector<32x128xf32>
    %c0_88 = arith.constant 0 : index
    %c3 = arith.constant 3 : index
    %c0_89 = arith.constant 0 : index
    %c0_90 = arith.constant 0 : index
    %134 = vector.load %arg5[%c0_88, %c3, %c0_89, %c0_90] : memref<3x4x8x128xf32, #tpu.memory_space<vmem>>, vector<1x1x8x128xf32>
    %135 = vector.shape_cast %134 : vector<1x1x8x128xf32> to vector<8x128xf32>
    %136 = arith.mulf %129, %133 : vector<32x128xf32>
    %137 = vector.shape_cast %136 : vector<32x128xf32> to vector<4x8x128xf32>
    %cst_91 = arith.constant dense<0.000000e+00> : vector<8x128xf32>
    %138 = vector.multi_reduction <add>, %137, %cst_91 [0] : vector<4x8x128xf32> to vector<8x128xf32>
    %139 = arith.addf %135, %138 : vector<8x128xf32>
    %c0_92 = arith.constant 0 : index
    %c3_93 = arith.constant 3 : index
    %c0_94 = arith.constant 0 : index
    %c0_95 = arith.constant 0 : index
    %140 = vector.load %arg5[%c0_92, %c3_93, %c0_94, %c0_95] : memref<3x4x8x128xf32, #tpu.memory_space<vmem>>, vector<1x1x8x128xf32>
    %141 = vector.shape_cast %140 : vector<1x1x8x128xf32> to vector<8x128xf32>
    %142 = vector.shape_cast %139 : vector<8x128xf32> to vector<1x1x8x128xf32>
    tpu.vector_store %arg5[%c0_92, %c3_93, %c0_94, %c0_95], %142 {strides = array<i32>} : memref<3x4x8x128xf32, #tpu.memory_space<vmem>>, vector<1x1x8x128xf32>,
    %c1_96 = arith.constant 1 : index
    %c3_97 = arith.constant 3 : index
    %c0_98 = arith.constant 0 : index
    %c0_99 = arith.constant 0 : index
    %143 = vector.load %arg5[%c1_96, %c3_97, %c0_98, %c0_99] : memref<3x4x8x128xf32, #tpu.memory_space<vmem>>, vector<1x1x8x128xf32>
    %144 = vector.shape_cast %143 : vector<1x1x8x128xf32> to vector<8x128xf32>
    %145 = arith.mulf %129, %129 : vector<32x128xf32>
    %146 = vector.shape_cast %145 : vector<32x128xf32> to vector<4x8x128xf32>
    %cst_100 = arith.constant dense<0.000000e+00> : vector<8x128xf32>
    %147 = vector.multi_reduction <add>, %146, %cst_100 [0] : vector<4x8x128xf32> to vector<8x128xf32>
    %148 = arith.addf %144, %147 : vector<8x128xf32>
    %c1_101 = arith.constant 1 : index
    %c3_102 = arith.constant 3 : index
    %c0_103 = arith.constant 0 : index
    %c0_104 = arith.constant 0 : index
    %149 = vector.load %arg5[%c1_101, %c3_102, %c0_103, %c0_104] : memref<3x4x8x128xf32, #tpu.memory_space<vmem>>, vector<1x1x8x128xf32>
    %150 = vector.shape_cast %149 : vector<1x1x8x128xf32> to vector<8x128xf32>
    %151 = vector.shape_cast %148 : vector<8x128xf32> to vector<1x1x8x128xf32>
    tpu.vector_store %arg5[%c1_101, %c3_102, %c0_103, %c0_104], %151 {strides = array<i32>} : memref<3x4x8x128xf32, #tpu.memory_space<vmem>>, vector<1x1x8x128xf32>,
    %c2_105 = arith.constant 2 : index
    %c3_106 = arith.constant 3 : index
    %c0_107 = arith.constant 0 : index
    %c0_108 = arith.constant 0 : index
    %152 = vector.load %arg5[%c2_105, %c3_106, %c0_107, %c0_108] : memref<3x4x8x128xf32, #tpu.memory_space<vmem>>, vector<1x1x8x128xf32>
    %153 = vector.shape_cast %152 : vector<1x1x8x128xf32> to vector<8x128xf32>
    %154 = vector.shape_cast %133 : vector<32x128xf32> to vector<4x8x128xf32>
    %cst_109 = arith.constant dense<0.000000e+00> : vector<8x128xf32>
    %155 = vector.multi_reduction <add>, %154, %cst_109 [0] : vector<4x8x128xf32> to vector<8x128xf32>
    %156 = arith.addf %153, %155 : vector<8x128xf32>
    %c2_110 = arith.constant 2 : index
    %c3_111 = arith.constant 3 : index
    %c0_112 = arith.constant 0 : index
    %c0_113 = arith.constant 0 : index
    %157 = vector.load %arg5[%c2_110, %c3_111, %c0_112, %c0_113] : memref<3x4x8x128xf32, #tpu.memory_space<vmem>>, vector<1x1x8x128xf32>
    %158 = vector.shape_cast %157 : vector<1x1x8x128xf32> to vector<8x128xf32>
    %159 = vector.shape_cast %156 : vector<8x128xf32> to vector<1x1x8x128xf32>
    tpu.vector_store %arg5[%c2_110, %c3_111, %c0_112, %c0_113], %159 {strides = array<i32>} : memref<3x4x8x128xf32, #tpu.memory_space<vmem>>, vector<1x1x8x128xf32>,
    %c0_i32_114 = arith.constant 0 : i32
    %160 = arith.cmpi eq, %arg1, %c0_i32_114 : i32
    %161 = arith.extui %160 : i1 to i32
    %c0_i32_115 = arith.constant 0 : i32
    %162 = arith.cmpi ne, %161, %c0_i32_115 : i32
    scf.if %162 {
      %c0_116 = arith.constant 0 : index
      %c0_117 = arith.constant 0 : index
      %c0_118 = arith.constant 0 : index
      %c0_119 = arith.constant 0 : index
      %163 = vector.load %arg5[%c0_116, %c0_117, %c0_118, %c0_119] : memref<3x4x8x128xf32, #tpu.memory_space<vmem>>, vector<3x4x8x128xf32>
      %cst_120 = arith.constant dense<0.000000e+00> : vector<3x4x8xf32>
      %164 = vector.multi_reduction <add>, %163, %cst_120 [3] : vector<3x4x8x128xf32> to vector<3x4x8xf32>
      %cst_121 = arith.constant dense<0.000000e+00> : vector<3x4xf32>
      %165 = vector.multi_reduction <add>, %164, %cst_121 [2] : vector<3x4x8xf32> to vector<3x4xf32>
      %c0_122 = arith.constant 0 : index
      %c0_123 = arith.constant 0 : index
      %c0_124 = arith.constant 0 : index
      %166 = vector.load %arg4[%c0_122, %c0_123, %c0_124] : memref<1x3x4xf32, #tpu.memory_space<vmem>>, vector<1x3x4xf32>
      %167 = vector.shape_cast %166 : vector<1x3x4xf32> to vector<3x4xf32>
      %168 = vector.shape_cast %165 : vector<3x4xf32> to vector<1x3x4xf32>
      tpu.vector_store %arg4[%c0_122, %c0_123, %c0_124], %168 {strides = array<i32>} : memref<1x3x4xf32, #tpu.memory_space<vmem>>, vector<1x3x4xf32>,
    } else {
    }
    return
  }
  func.func @transform_0(%arg0: i32, %arg1: i32) -> (i32, i32, i32, i32) {
    %c0_i32 = arith.constant 0 : i32
    %c0_i32_0 = arith.constant 0 : i32
    %c0_i32_1 = arith.constant 0 : i32
    return %arg0, %c0_i32, %arg1, %c0_i32_0 : i32, i32, i32, i32
  }
  func.func @transform_1(%arg0: i32, %arg1: i32) -> (i32, i32, i32) {
    %c0_i32 = arith.constant 0 : i32
    %c0_i32_0 = arith.constant 0 : i32
    return %arg0, %arg1, %c0_i32 : i32, i32, i32
  }
  func.func @transform_2(%arg0: i32, %arg1: i32) -> (i32, i32, i32) {
    %c0_i32 = arith.constant 0 : i32
    %c0_i32_0 = arith.constant 0 : i32
    %c0_i32_1 = arith.constant 0 : i32
    return %arg0, %c0_i32, %c0_i32_0 : i32, i32, i32
  }
}

</mosaic_0001>

<bundles_post_ra>
// kernel: tpu_custom_call.1
= control target key start
LH: loop header
LB: loop body
LE: loop exit
PB: predicated region body
PF: predicated region fallthrough
CT: control target
= control target key end

     0   :  { %7 = vsyncpa [#allocation4], 0  ;;  %s1539_s0 = inlined_call_operand.hbm [shape: f32[2,4,32,128], index: 0, kind: input, shape index: {}]   ;;  %s1540_s1 = inlined_call_operand.hbm [shape: s8[2,32,128], index: 1, kind: input, shape index: {}]   ;;  %s1541_s2 = inlined_call_operand.vmem [shape: f32[2,3,4], index: 2, kind: output, shape index: {}]  }
   0x1   :  { %9 = vsyncpa [#allocation4 + $0x1], 0 }
   0x2   :  { %10 = vsyncpa [#allocation6], 0 }
   0x3   :  { %12 = vsyncpa [#allocation6 + $0x1], 0  ;;  %s1079_s9 = smov 0   ;;  %s1081_s10 = smov 0  }
   0x4   :  { %s1083_s11 = smov 0   ;;  %s1085_s12 = smov 0  }
   0x5   :  { %s1087_s13 = smov 0   ;;  %s1089_s14 = smov 0  }
   0x6 LB: > { %s804_s15 = sadd.s32 4294967295, %s1057_s14   ;;  %s30_s16 = sadd.s32 1, %s1053_s13  ;;  %s1057_s14 = sphi %s1089_s14, %s18_s14   ;;  %s1053_s13 = sphi %s1087_s13, %s1553_s13   ;;  %s1049_s12 = sphi %s1085_s12, %s1552_s12   ;;  %s1045_s11 = sphi %s1083_s11, %s1551_s11   ;;  %s1041_s10 = sphi %s1081_s10, %s1550_s10   ;;  %s1037_s9 = sphi %s1079_s9, %s1549_s9  }
   0x7   : > { %p32_p0 = scmp.ge.s32.totalorder %s30_s16, 2  ;;  %s39_s17 = sadd.s32 1, %s1045_s11 }
   0x8   : > { %p46_p1 = scmp.ne.s32.totalorder %s1045_s11, %s1041_s10  ;;  %p47_p2 = scmp.eq.s32.totalorder %s1057_s14, 0 }
   0x9   : > { %s1555_s16 = smov (%p32_p0, %s30_s16), 0  ;;  %p52_p4 = scmp.ne.s32.totalorder %s1041_s10, %s1037_s9 }
   0xa   : > { %p1115_p3 = por %p47_p2, %p46_p1  ;;  %s34_s19 = ssub.s32 %s1053_s13, %s1555_s16 }
   0xb   : > { %p53_p5 = scmp.eq.s32.totalorder %s804_s15, 0  ;;  %p37_p6 = scmp.eq.s32.totalorder %s34_s19, 0 }
   0xc   : > { %p851_p8 = scmp.lt.s32.totalorder %s1057_s14, 2  ;;  %s1131_s22 = sand.u32 1, %s1045_s11  }
   0xd   : > { %p1122_p7 = por %p53_p5, %p52_p4  ;;  %s839_s23 = sshll.u32 %s1053_s13, 11 }
   0xe   : > { %s1128_s21 = scalar_select %p37_p6, %s1045_s11, %s39_s17  }
   0xf   : > { %s1544_s20 = scalar_select %p1122_p7, 1, 0 }
  0x10   : > { %s808_s24 = sshll.u32 %s1131_s22, 7  ;;  %s1138_s27 = scalar_lea.hbm %s1539_s0, %s839_s23 }
  0x11   : > { %s134_s28 = scalar_lea.vmem [#allocation3], %s808_s24  ;;  %p1142_p9 = pnand %p851_p8, %p1115_p3 }
  0x12   : > { %s143_s29 = sshll.u32 %s134_s28, 4  ;;  %s131_s3 = scalar_lea.sflag [#allocation4], %s1131_s22  ;;  %s1146_s29 = int_to_ptr.vmem [resolvable:$true] %s143_s29 }
  0x13   : > { %s943_s4 = scalar_lea.hbm %s1138_s27, 2048  ;;  %p945_p11 = pneg %p1142_p9 }
  0x14   : > { %p944_p10 = scmp.ne.s32.totalorder %s1138_s27, %s943_s4  ;;  %s948_s7 = scalar_lea.hbm %s1539_s0, 4096 }
  0x15   : > { %p949_p0 = scmp.lt.u32.totalorder %s1138_s27, %s1539_s0  ;;  %p950_p1 = scmp.lt.u32.totalorder %s948_s7, %s943_s4 }
  0x16   : > { %p946_p12 = pnand %p945_p11, %p944_p10  ;;  %p952_p3 = scmp.lt.u32.totalorder %s943_s4, %s1138_s27 }
  0x17   : > { %p951_p2 = por %p950_p1, %p949_p0 }
  0x18   : > { %p947_p13 = pneg %p946_p12 }
  0x19   : > { %p953_p4 = por %p952_p3, %p951_p2 }
  0x1b   : > { %p954_p5 = pnand %p953_p4, %p947_p13 }
  0x1d   : > { %957 = shalt.err (!%p954_p5)
}
  0x1e   : > { %s958_s15 = scalar_lea.vmem %s1146_s29, 2048  ;;  %s1059_s17 = smov [#allocation3]  }
  0x1f   : > { %p959_p6 = scmp.ne.s32.totalorder %s1146_s29, %s958_s15  ;;  %s963_s18 = sshll.u32 %s1059_s17, 4  ;;  %s964_s18 = int_to_ptr.vmem [resolvable:$false] %s963_s18 }
  0x20   : > { %s965_s19 = scalar_lea.vmem %s964_s18, 4096  ;;  %p966_p12 = scmp.lt.s32.totalorder %s1146_s29, %s964_s18 }
  0x21   : > { %p961_p8 = pnand %p959_p6, %p945_p11  ;;  %p967_p0 = scmp.lt.s32.totalorder %s965_s19, %s958_s15 }
  0x23   : > { %p962_p10 = pneg %p961_p8  ;;  %p968_p1 = por %p967_p0, %p966_p12 }
  0x25   : > { %p969_p2 = pnand %p968_p1, %p962_p10 }
  0x27   : > { %972 = shalt.err (!%p969_p2)
}
  0x28   : > { %s1060_s23 = smov 128   ;;  %s1061_s24 = smov 8  }
  0x29   : > { %847 = dma.hbm_to_vmem [thread:$0]  (!%p1142_p9), %s1138_s27, 2048, %s1146_s29, %s131_s3, %s1060_s23, %s1060_s23, %s1061_s24  }
  0x2a   : > { %p813_p13 = scmp.ge.s32.totalorder %s1057_s14, 1  ;;  %p170_p3 = scmp.lt.s32.totalorder %s1057_s14, 3 }
  0x2b   : > { %s811_s25 = sshll.u32 %s1131_s22, 3  ;;  %s812_s28 = sshll.u32 %s1053_s13, 7 }
  0x2c   : > { %p1179_p4 = pnand %p813_p13, %p170_p3  ;;  %s157_s4 = scalar_lea.vmem [#allocation5], %s811_s25 }
  0x2d   : > { %s165_s5 = sshll.u32 %s157_s4, 4  ;;  %s1187_s8 = scalar_lea.hbm %s1540_s1, %s812_s28  ;;  %s166_s5 = int_to_ptr.vmem [resolvable:$true] %s165_s5 }
  0x2e   : > { %s1546_s26 = scalar_select %p1179_p4, 1, 0 }
  0x2f   : > { %s154_s27 = scalar_lea.sflag [#allocation6], %s1131_s22  ;;  %s973_s29 = scalar_lea.hbm %s1187_s8, 128 }
  0x30   : > { %p974_p5 = scmp.ne.s32.totalorder %s1187_s8, %s973_s29  ;;  %s978_s15 = scalar_lea.hbm %s1540_s1, 256 }
  0x31   : > { %p979_p10 = scmp.lt.u32.totalorder %s1187_s8, %s1540_s1  ;;  %p980_p12 = scmp.lt.u32.totalorder %s978_s15, %s973_s29 }
  0x32   : > { %p976_p6 = pnand %p974_p5, %p945_p11  ;;  %p982_p1 = scmp.lt.u32.totalorder %s973_s29, %s1187_s8 }
  0x33   : > { %p981_p0 = por %p980_p12, %p979_p10 }
  0x34   : > { %p977_p8 = pneg %p976_p6 }
  0x35   : > { %p983_p2 = por %p982_p1, %p981_p0 }
  0x37   : > { %p984_p13 = pnand %p983_p2, %p977_p8 }
  0x39   : > { %987 = shalt.err (!%p984_p13)
}
  0x3a   : > { %s988_s22 = scalar_lea.vmem %s166_s5, 128  ;;  %s1062_s19 = smov [#allocation5]  }
  0x3b   : > { %p989_p3 = scmp.ne.s32.totalorder %s166_s5, %s988_s22  ;;  %s993_s23 = sshll.u32 %s1062_s19, 4  ;;  %s994_s23 = int_to_ptr.vmem [resolvable:$false] %s993_s23 }
  0x3c   : > { %s995_s24 = scalar_lea.vmem %s994_s23, 256  ;;  %p996_p7 = scmp.lt.s32.totalorder %s166_s5, %s994_s23 }
  0x3d   : > { %p991_p5 = pnand %p989_p3, %p945_p11  ;;  %p997_p4 = scmp.lt.s32.totalorder %s995_s24, %s988_s22 }
  0x3f   : > { %p992_p6 = pneg %p991_p5  ;;  %p998_p10 = por %p997_p4, %p996_p7 }
  0x41   : > { %p999_p12 = pnand %p998_p10, %p992_p6 }
  0x43   : > { %1002 = shalt.err (!%p999_p12)
}
  0x44   : > { %850 = dma.hbm_to_vmem [thread:$0]  (!%p1142_p9), %s1187_s8, 128, %s166_s5, %s154_s27  }
  0x45   : > { %p1547_p8 = scmp.ne.s32.totalorder %s1546_s26, 0 }
  0x46   : > { %s176_s25 = sand.u32 (!%p1547_p8), 1, %s1041_s10   ;;  %p1548_p11 = scmp.ne.s32.totalorder (!%p1547_p8), %s1544_s20, 0 }
  0x47   : > { %174 = sbr.rel (%p1547_p8) target bundleno = 458 (0x1ca), region = 28  ;;  %s814_s28 = sshll.u32 (!%p1547_p8), %s176_s25, 7 }
  0x48   : > { %s177_s4 = scalar_lea.sflag (!%p1547_p8), [#allocation4], %s176_s25  ;;  %s1212_s6 = scalar_lea.vmem (!%p1547_p8), [#allocation3], %s814_s28 }
  0x4e   : > { %1028 = dma.done.wait (%p1548_p11), %s177_s4, 2048  }
  0x4f   : > { %1030 = vsyncadd (%p1548_p11), %s177_s4, 4294965248  ;;  %s815_s7 = sshll.u32 %s176_s25, 3  ;;  %s186_s30 = scalar_lea.sflag [#allocation6], %s176_s25 }
  0x50   : > { %s189_s29 = scalar_lea.vmem [#allocation5], %s815_s7 }
  0x51   : > { %1032 = dma.done.wait (%p1548_p11), %s186_s30, 128  }
  0x52   : > { %1034 = vsyncadd (%p1548_p11), %s186_s30, 4294967168  ;;  %v344_v0 = vlaneseq  ;;  %v392_v4 = vld [vmem:[%s189_s29] sm:$0xff]  ;;  %v237_v11 = vld [vmem:[%s1212_s6 + $0x10] sm:$0xff]  ;;  %v1063_v17 = vmov 0.0   ;;  %p215_p7 = scmp.lt.s32.totalorder %s1049_s12, 1 }
  0x53   : > { %v1230_v5 = vunpack.c.0.s8 %v392_v4  ;;  %v1232_v6 = vunpack.c.1.s8 %v392_v4  ;;  %v1234_v7 = vunpack.c.2.s8 %v392_v4  ;;  %v235_v8 = vld [vmem:[%s1212_s6] sm:$0xff]  ;;  %v236_v9 = vld [vmem:[%s1212_s6 + $0x8] sm:$0xff]  ;;  %v1238_v10 = vunpack.c.3.s8 %v392_v4  ;;  %v238_v12 = vld [vmem:[%s1212_s6 + $0x18] sm:$0xff] }
  0x54   : > { %v1222_v1 = vshrl.u32 %v344_v0, 7  ;;  %v1224_v2 = vand.u32 127, %v344_v0  ;;  %v239_v13 = vld [vmem:[%s1212_s6 + $0x20] sm:$0xff]  ;;  %v240_v14 = vld [vmem:[%s1212_s6 + $0x28] sm:$0xff]  ;;  %v1247_v15 = vld [vmem:[%s1212_s6 + $0x30] sm:$0xff]  ;;  %s1557_s12 = smov (!%p215_p7, %s1049_s12), 1 }
  0x55   : > { %vm437_vm0 = vcmp.eq.s32.totalorder %v1230_v5, 1  ;;  %vm438_vm1 = vcmp.eq.s32.totalorder %v1232_v6, 1  ;;  %v1250_v16 = vld [vmem:[%s1212_s6 + $0x38] sm:$0xff]  ;;  %vm439_vm2 = vcmp.eq.s32.totalorder %v1234_v7, 1  ;;  %vm440_vm3 = vcmp.eq.s32.totalorder %v1238_v10, 1  ;;  %v1258_v19 = vld [vmem:[%s1212_s6 + $0x40] sm:$0xff] }
  0x56   : > { %v1228_v3 = vsub.s32 %v1224_v2, %v1222_v1  ;;  %v1255_v18 = vsel %vm437_vm0, 1.0, %v1063_v17  ;;  %v1261_v20 = vsel %vm438_vm1, 1.0, %v1063_v17  ;;  %v1264_v21 = vsel %vm439_vm2, 1.0, %v1063_v17  ;;  %v1267_v22 = vld [vmem:[%s1212_s6 + $0x48] sm:$0xff]  ;;  %v1270_v23 = vld [vmem:[%s1212_s6 + $0x50] sm:$0xff]  ;;  %v1273_v24 = vld [vmem:[%s1212_s6 + $0x58] sm:$0xff] }
  0x57   : > { %v251_v25 = vmax.f32 %v235_v8, %v239_v13  ;;  %v473_v26 = vadd.f32 %v1261_v20, %v1255_v18  ;;  %v1278_v27 = vld [vmem:[%s1212_s6 + $0x60] sm:$0xff]  ;;  %v254_v28 = vmax.f32 %v236_v9, %v240_v14  ;;  %v257_v29 = vmax.f32 %v237_v11, %v1247_v15  ;;  %v248_v32 = vld [vmem:[%s1212_s6 + $0x68] sm:$0xff]  ;;  %v1287_v33 = vld [vmem:[%s1212_s6 + $0x70] sm:$0xff]  ;;  %s816_s20 = sshll.u32 %s1557_s12, 2 }
  0x58   : > { %v260_v30 = vmax.f32 %v238_v12, %v1250_v16  ;;  %v1283_v31 = vsel %vm440_vm3, 1.0, %v1063_v17  ;;  %v1290_v34 = vld [vmem:[%s1212_s6 + $0x78] sm:$0xff]  ;;  %vm397_vm4 = vcmp.eq.s32.totalorder %v1230_v5, 0  ;;  %vm398_vm5 = vcmp.eq.s32.totalorder %v1232_v6, 0  ;;  %s218_s8 = scalar_lea.vmem %s1541_s2, %s816_s20 }
  0x59   : > { %v252_v35 = vmax.f32 %v251_v25, %v1258_v19  ;;  %v474_v36 = vadd.f32 %v1264_v21, %v473_v26  ;;  %v255_v37 = vmax.f32 %v254_v28, %v1267_v22  ;;  %v258_v38 = vmax.f32 %v257_v29, %v1270_v23 }
  0x5a   : > { %v261_v39 = vmax.f32 %v260_v30, %v1273_v24  ;;  %vm399_vm6 = vcmp.eq.s32.totalorder %v1234_v7, 0  ;;  %v1311_v51 = vsel %vm397_vm4, 1.0, %v1063_v17  ;;  %v1314_v52 = vsel %vm398_vm5, 1.0, %v1063_v17 }
  0x5b   : > { %v253_v40 = vmax.f32 %v252_v35, %v1278_v27  ;;  %v475_v41 = vadd.f32 %v1283_v31, %v474_v36  ;;  %v256_v42 = vmax.f32 %v255_v37, %v248_v32  ;;  %v1300_v43 = vmax.f32 %v258_v38, %v1287_v33 }
  0x5c   : > { %v1303_v44 = vmax.f32 %v261_v39, %v1290_v34  ;;  %vm400_vm7 = vcmp.eq.s32.totalorder %v1238_v10, 0  ;;  %v432_v62 = vadd.f32 %v1314_v52, %v1311_v51  ;;  %vm519_vm8 = vcmp.eq.s32.totalorder %v1230_v5, 3 }
  0x5d   : > { %v263_v45 = vsub.f32 %v235_v8, %v253_v40  ;;  %593 = vadd.xlane.f32.xlu1 %v475_v41  ;;  %v264_v46 = vsub.f32 %v236_v9, %v256_v42  ;;  %v265_v47 = vsub.f32 %v237_v11, %v1300_v43  ;;  %v267_v49 = vsub.f32 %v239_v13, %v253_v40 }
  0x5e   : > { %v266_v48 = vsub.f32 %v238_v12, %v1303_v44  ;;  %v268_v50 = vsub.f32 %v240_v14, %v256_v42  ;;  %v269_v53 = vsub.f32 %v1247_v15, %v1300_v43  ;;  %v270_v57 = vsub.f32 %v1250_v16, %v1303_v44 }
  0x5f   : > { %v279_v54 = vmul.f32 1.442695, %v263_v45  ;;  %v281_v55 = vmul.f32 1.442695, %v264_v46  ;;  %v283_v56 = vmul.f32 1.442695, %v265_v47  ;;  %v271_v58 = vsub.f32 %v1258_v19, %v253_v40 }
  0x60   : > { %v285_v59 = vmul.f32 1.442695, %v266_v48  ;;  %v275_v60 = vsub.f32 %v1278_v27, %v253_v40  ;;  %v287_v61 = vmul.f32 1.442695, %v267_v49  ;;  %v272_v63 = vsub.f32 %v1267_v22, %v256_v42 }
  0x61   : > { %903 = vpow2.f32 %v279_v54  ;;  %v273_v0 = vsub.f32 %v1270_v23, %v1300_v43  ;;  %v289_v4 = vmul.f32 1.442695, %v268_v50  ;;  %v274_v8 = vsub.f32 %v1273_v24, %v1303_v44 }
  0x62   : > { %905 = vpow2.f32 %v281_v55  ;;  %v276_v9 = vsub.f32 %v248_v32, %v256_v42  ;;  %v291_v11 = vmul.f32 1.442695, %v269_v53  ;;  %v293_v12 = vmul.f32 1.442695, %v270_v57 }
  0x63   : > { %907 = vpow2.f32 %v283_v56  ;;  %v1333_v13 = vsel %vm399_vm6, 1.0, %v1063_v17  ;;  %v1338_v14 = vsel %vm400_vm7, 1.0, %v1063_v17  ;;  %v277_v15 = vsub.f32 %v1287_v33, %v1300_v43 }
  0x64   : > { %909 = vpow2.f32 %v285_v59  ;;  %v295_v16 = vmul.f32 1.442695, %v271_v58  ;;  %v433_v19 = vadd.f32 %v1333_v13, %v432_v62  ;;  %v278_v22 = vsub.f32 %v1290_v34, %v1303_v44 }
  0x65   : > { %911 = vpow2.f32 %v287_v61  ;;  %v297_v23 = vmul.f32 1.442695, %v272_v63  ;;  %v299_v24 = vmul.f32 1.442695, %v273_v0  ;;  %v301_v25 = vmul.f32 1.442695, %v274_v8 }
  0x66   : > { %913 = vpow2.f32 %v289_v4  ;;  %v303_v26 = vmul.f32 1.442695, %v275_v60  ;;  %v434_v27 = vadd.f32 %v1338_v14, %v433_v19  ;;  %v305_v28 = vmul.f32 1.442695, %v276_v9 }
  0x67   : > { %915 = vpow2.f32 %v291_v11  ;;  %vm520_vm9 = vcmp.eq.s32.totalorder %v1232_v6, 3  ;;  %vm521_vm10 = vcmp.eq.s32.totalorder %v1234_v7, 3  ;;  %vm522_vm11 = vcmp.eq.s32.totalorder %v1238_v10, 3 }
  0x68   : > { %917 = vpow2.f32 %v293_v12  ;;  %591 = vadd.xlane.f32.xlu0 %v434_v27  ;;  %v1351_v29 = vsel %vm519_vm8, 1.0, %v1063_v17  ;;  %v1354_v30 = vsel %vm520_vm9, 1.0, %v1063_v17  ;;  %v1357_v32 = vsel %vm521_vm10, 1.0, %v1063_v17 }
  0x69   : > { %919 = vpow2.f32 %v295_v16  ;;  %v1360_v33 = vsel %vm522_vm11, 1.0, %v1063_v17  ;;  %v307_v35 = vmul.f32 1.442695, %v277_v15  ;;  %v555_v36 = vadd.f32 %v1354_v30, %v1351_v29 }
  0x6a   : > { %921 = vpow2.f32 %v297_v23  ;;  %v309_v38 = vmul.f32 1.442695, %v278_v22  ;;  %v346_v55 = vadd.s32 8, %v1222_v1  ;;  %v347_v56 = vadd.s32 16, %v1222_v1 }
  0x6b   : > { %v1362_v34 = vpop.eup %903  ;;  %923 = vpow2.f32 %v299_v24  ;;  %v556_v40 = vadd.f32 %v1357_v32, %v555_v36  ;;  %v348_v59 = vadd.s32 24, %v1222_v1  ;;  %v349_v0 = vmul.u32 128, %v1222_v1 }
  0x6c   : > { %v1366_v37 = vpop.eup %905  ;;  %925 = vpow2.f32 %v301_v25  ;;  %v350_v9 = vmul.u32 128, %v346_v55  ;;  %v351_v11 = vmul.u32 128, %v347_v56  ;;  %vm478_vm0 = vcmp.eq.s32.totalorder %v1230_v5, 2 }
  0x6d   : > { %v1368_v39 = vpop.eup %907  ;;  %927 = vpow2.f32 %v303_v26  ;;  %v1374_v43 = vadd.f32 %v1360_v33, %v556_v40  ;;  %v352_v16 = vmul.u32 128, %v348_v59  ;;  %v360_v1 = vadd.s32 %v1224_v2, %v349_v0 }
  0x6e   : > { %v1371_v41 = vpop.eup %909  ;;  %929 = vpow2.f32 %v305_v28  ;;  %v361_v25 = vadd.s32 %v1224_v2, %v350_v9  ;;  %v362_v26 = vadd.s32 %v1224_v2, %v351_v11  ;;  %vm479_vm1 = vcmp.eq.s32.totalorder %v1232_v6, 2 }
  0x6f   : > { %v912_v42 = vpop.eup %911  ;;  %931 = vpow2.f32 %v307_v35  ;;  %v363_v27 = vadd.s32 %v1224_v2, %v352_v16  ;;  %vm364_vm12 = vcmp.lt.s32.totalorder %v360_v1, 256  ;;  %vm480_vm2 = vcmp.eq.s32.totalorder %v1234_v7, 2 }
  0x70   : > { %v914_v44 = vpop.eup %913  ;;  %933 = vpow2.f32 %v309_v38  ;;  %v311_v45 = vadd.f32 %v912_v42, %v1362_v34  ;;  %vm365_vm13 = vcmp.lt.s32.totalorder %v361_v25, 256  ;;  %vm366_vm14 = vcmp.lt.s32.totalorder %v362_v26, 256 }
  0x71   : > { %v916_v46 = vpop.eup %915  ;;  %v314_v47 = vadd.f32 %v914_v44, %v1366_v37  ;;  %vm367_vm15 = vcmp.lt.s32.totalorder %v363_v27, 256  ;;  %v1407_v28 = vsel %vm364_vm12, 1.0, %v1063_v17  ;;  %v1410_v35 = vsel %vm365_vm13, 1.0, %v1063_v17 }
  0x72   : > { %v1378_v48 = vpop.eup %917  ;;  %v317_v49 = vadd.f32 %v916_v46, %v1368_v39  ;;  %v1413_v36 = vsel %vm366_vm14, 1.0, %v1063_v17  ;;  %v1416_v38 = vsel %vm367_vm15, 1.0, %v1063_v17  ;;  %v1419_v40 = vsel %vm478_vm0, 1.0, %v1063_v17 }
  0x73   : > { %v920_v50 = vpop.eup %919  ;;  %v320_v53 = vadd.f32 %v1378_v48, %v1371_v41  ;;  %v1422_v5 = vsel %vm479_vm1, 1.0, %v1063_v17  ;;  %v1425_v6 = vsel %vm480_vm2, 1.0, %v1063_v17  ;;  %vm481_vm3 = vcmp.eq.s32.totalorder %v1238_v10, 2 }
  0x74   : > { %v922_v54 = vpop.eup %921  ;;  %v312_v57 = vadd.f32 %v920_v50, %v311_v45  ;;  %vm661_vm4 = vcmask 1042434   ;;  %vm659_vm5 = vcmask 1041409   ;;  %vm663_vm6 = vcmask 1043459  }
  0x75   : > { %v1385_v58 = vpop.eup %923  ;;  %v315_v60 = vadd.f32 %v922_v54, %v314_v47  ;;  %vm674_vm7 = vcmask 60416   ;;  %vm702_vm8 = vcmask 26624  }
  0x76   : > { %v1388_v61 = vpop.eup %925  ;;  %v318_v62 = vadd.f32 %v1385_v58, %v317_v49 }
  0x77   : > { %v928_v63 = vpop.eup %927  ;;  %v321_v4 = vadd.f32 %v1388_v61, %v320_v53 }
  0x78   : > { %v930_v8 = vpop.eup %929  ;;  %v313_v12 = vadd.f32 %v928_v63, %v312_v57 }
  0x79   : > { %v1393_v15 = vpop.eup %931  ;;  %v316_v19 = vadd.f32 %v930_v8, %v315_v60 }
  0x7a   : > { %v1395_v22 = vpop.eup %933  ;;  %v319_v23 = vadd.f32 %v1393_v15, %v318_v62  ;;  %935 = vrcp.f32 %v313_v12 }
  0x7b   : > { %v322_v24 = vadd.f32 %v1395_v22, %v321_v4  ;;  %937 = vrcp.f32 %v316_v19 }
  0x7c   : > { %939 = vrcp.f32 %v319_v23 }
  0x7d   : > { %941 = vrcp.f32 %v322_v24 }
  0x84   : > { %v936_v2 = vpop.eup %935 }
  0x85   : > { %v938_v7 = vpop.eup %937  ;;  %v331_v45 = vmul.f32 %v936_v2, %v912_v42  ;;  %v324_v47 = vmul.f32 %v936_v2, %v1362_v34  ;;  %v335_v49 = vmul.f32 %v936_v2, %v920_v50  ;;  %v1428_v53 = vmul.f32 %v936_v2, %v928_v63 }
  0x86   : > { %v1430_v55 = vpop.eup %939  ;;  %v332_v56 = vmul.f32 %v938_v7, %v914_v44  ;;  %v326_v57 = vmul.f32 %v938_v7, %v1366_v37  ;;  %v336_v59 = vmul.f32 %v938_v7, %v922_v54  ;;  %v1433_v60 = vmul.f32 %v938_v7, %v930_v8 }
  0x87   : > { %v942_v62 = vpop.eup %941  ;;  %v333_v0 = vmul.f32 %v1430_v55, %v916_v46  ;;  %v380_v4 = vmul.f32 %v1407_v28, %v331_v45  ;;  %v328_v42 = vmul.f32 %v1430_v55, %v1368_v39  ;;  %v376_v34 = vmul.f32 %v1407_v28, %v324_v47 }
  0x88   : > { %v334_v50 = vmul.f32 %v942_v62, %v1378_v48  ;;  %v381_v63 = vmul.f32 %v1410_v35, %v332_v56  ;;  %v330_v44 = vmul.f32 %v942_v62, %v1371_v41  ;;  %v377_v37 = vmul.f32 %v1410_v35, %v326_v57 }
  0x89   : > { %v382_v54 = vmul.f32 %v1413_v36, %v333_v0  ;;  %v451_v46 = vmul.f32 %v1255_v18, %v380_v4  ;;  %v378_v8 = vmul.f32 %v1413_v36, %v328_v42  ;;  %v410_v39 = vmul.f32 %v1311_v51, %v376_v34 }
  0x8a   : > { %v383_v9 = vmul.f32 %v1416_v38, %v334_v50  ;;  %v452_v48 = vmul.f32 %v1261_v20, %v381_v63  ;;  %v379_v11 = vmul.f32 %v1416_v38, %v330_v44  ;;  %v411_v41 = vmul.f32 %v1314_v52, %v377_v37 }
  0x8b   : > { %v453_v12 = vmul.f32 %v1264_v21, %v382_v54  ;;  %v412_v16 = vmul.f32 %v1333_v13, %v378_v8  ;;  %v421_v19 = vmul.f32 %v376_v34, %v376_v34  ;;  %v422_v23 = vmul.f32 %v377_v37, %v377_v37 }
  0x8c   : > { %v454_v18 = vmul.f32 %v1283_v31, %v383_v9  ;;  %v413_v24 = vmul.f32 %v1338_v14, %v379_v11  ;;  %v423_v1 = vmul.f32 %v378_v8, %v378_v8  ;;  %v424_v51 = vmul.f32 %v379_v11, %v379_v11 }
  0x8d   : > { %v425_v25 = vadd.f32 %v422_v23, %v421_v19  ;;  %v414_v26 = vadd.f32 %v411_v41, %v410_v39  ;;  %v462_v27 = vmul.f32 %v380_v4, %v380_v4  ;;  %v463_v20 = vmul.f32 %v381_v63, %v381_v63 }
  0x8e   : > { %v464_v2 = vmul.f32 %v382_v54, %v382_v54  ;;  %v465_v7 = vmul.f32 %v383_v9, %v383_v9  ;;  %v455_v45 = vadd.f32 %v452_v48, %v451_v46  ;;  %v337_v21 = vmul.f32 %v1430_v55, %v1385_v58 }
  0x8f   : > { %v426_v52 = vadd.f32 %v425_v25, %v423_v1  ;;  %v415_v13 = vadd.f32 %v414_v26, %v412_v16  ;;  %v466_v47 = vadd.f32 %v463_v20, %v462_v27  ;;  %v338_v56 = vmul.f32 %v942_v62, %v1388_v61 }
  0x90   : > { %v456_v31 = vadd.f32 %v455_v45, %v453_v12  ;;  %v384_v14 = vmul.f32 %v1407_v28, %v335_v49  ;;  %v385_v57 = vmul.f32 %v1410_v35, %v336_v59  ;;  %v386_v0 = vmul.f32 %v1413_v36, %v337_v21 }
  0x91   : > { %v427_v4 = vadd.f32 %v426_v52, %v424_v51  ;;  %v416_v42 = vadd.f32 %v415_v13, %v413_v24  ;;  %v467_v34 = vadd.f32 %v466_v47, %v464_v2  ;;  %v387_v50 = vmul.f32 %v1416_v38, %v338_v56 }
  0x92   : > { %v503_v63 = vmul.f32 %v384_v14, %v384_v14  ;;  %v504_v44 = vmul.f32 %v385_v57, %v385_v57  ;;  %v505_v58 = vmul.f32 %v386_v0, %v386_v0  ;;  %v457_v54 = vadd.f32 %v456_v31, %v454_v18 }
  0x93   : > { %583 = vadd.xlane.f32.xlu1 %v427_v4  ;;  %575 = vadd.xlane.f32.xlu0 %v416_v42  ;;  %v468_v37 = vadd.f32 %v467_v34, %v465_v7  ;;  %v832_v61 = vsel %vm481_vm3, 1.0, %v1063_v17  ;;  %v492_v49 = vmul.f32 %v1419_v40, %v384_v14  ;;  %v506_v59 = vmul.f32 %v387_v50, %v387_v50 }
  0x94   : > { %v507_v46 = vadd.f32 %v504_v44, %v503_v63  ;;  %v493_v8 = vmul.f32 %v1422_v5, %v385_v57  ;;  %v494_v39 = vmul.f32 %v1425_v6, %v386_v0  ;;  %v341_v9 = vmul.f32 %v1430_v55, %v1393_v15 }
  0x95   : > { %v342_v48 = vmul.f32 %v942_v62, %v1395_v22  ;;  %v388_v11 = vmul.f32 %v1407_v28, %v1428_v53  ;;  %v389_v10 = vmul.f32 %v1410_v35, %v1433_v60  ;;  %v495_v41 = vmul.f32 %v832_v61, %v387_v50 }
  0x96   : > { %v508_v17 = vadd.f32 %v507_v46, %v505_v58  ;;  %v496_v12 = vadd.f32 %v493_v8, %v492_v49  ;;  %v390_v16 = vmul.f32 %v1413_v36, %v341_v9  ;;  %v514_v53 = vadd.f32 %v1422_v5, %v1419_v40 }
  0x97   : > { %585 = vadd.xlane.f32.xlu1 %v468_v37  ;;  %577 = vadd.xlane.f32.xlu0 %v457_v54  ;;  %v391_v19 = vmul.f32 %v1416_v38, %v342_v48  ;;  %v544_v23 = vmul.f32 %v388_v11, %v388_v11  ;;  %v545_v55 = vmul.f32 %v389_v10, %v389_v10 }
  0x98   : > { %v509_v18 = vadd.f32 %v508_v17, %v506_v59  ;;  %v497_v15 = vadd.f32 %v496_v12, %v494_v39  ;;  %v533_v22 = vmul.f32 %v1351_v29, %v388_v11  ;;  %v546_v62 = vmul.f32 %v390_v16, %v390_v16 }
  0x99   : > { %v534_v28 = vmul.f32 %v1354_v30, %v389_v10  ;;  %v535_v35 = vmul.f32 %v1357_v32, %v390_v16  ;;  %v547_v24 = vmul.f32 %v391_v19, %v391_v19  ;;  %v548_v1 = vadd.f32 %v545_v55, %v544_v23 }
  0x9a   : > { %v498_v60 = vadd.f32 %v497_v15, %v495_v41  ;;  %v536_v36 = vmul.f32 %v1360_v33, %v391_v19  ;;  %v515_v29 = vadd.f32 %v1425_v6, %v514_v53 }
  0x9b   : > { %587 = vadd.xlane.f32.xlu1 %v509_v18  ;;  %v537_v38 = vadd.f32 %v534_v28, %v533_v22  ;;  %v549_v51 = vadd.f32 %v548_v1, %v546_v62 }
  0x9c   : > { %579 = vadd.xlane.f32.xlu0 %v498_v60  ;;  %v516_v30 = vadd.f32 %v832_v61, %v515_v29 }
  0x9d   : > { %v538_v25 = vadd.f32 %v537_v38, %v535_v35  ;;  %v550_v26 = vadd.f32 %v549_v51, %v547_v24 }
  0x9f   : > { %v539_v27 = vadd.f32 %v538_v25, %v536_v36  ;;  %589 = vadd.xlane.f32.xlu1 %v550_v26 }
  0xa1   : > { %581 = vadd.xlane.f32.xlu0 %v539_v27 }
  0xa3   : > { %597 = vadd.xlane.f32.xlu1 %v1374_v43 }
  0xa5   : > { %595 = vadd.xlane.f32.xlu0 %v516_v30 }
  0xea   : > { %v594_v32 = vpop.xlane.xlu1 %593 }
  0xeb   : > { %v650_v34 = vrot.slane %v594_v32, %v1228_v3 }
  0xf5   : > { %v592_v40 = vpop.xlane.xlu0 %591 }
  0xf6   : > { %v646_v50 = vrot.slane %v592_v40, %v1228_v3 }
  0xf8   : > { %v668_v8 = vsel %vm659_vm5, %v650_v34, %v646_v50 }
 0x120   : > { %v584_v5 = vpop.xlane.xlu1 %583  ;;  %v576_v20 = vpop.xlane.xlu0 %575 }
 0x121   : > { %v630_v13 = vrot.slane %v584_v5, %v1228_v3  ;;  %v614_v43 = vrot.slane %v576_v20, %v1228_v3 }
 0x124   : > { %v586_v2 = vpop.xlane.xlu1 %585  ;;  %v578_v33 = vpop.xlane.xlu0 %577 }
 0x125   : > { %v634_v21 = vrot.slane %v586_v2, %v1228_v3  ;;  %v618_v6 = vrot.slane %v578_v33, %v1228_v3 }
 0x127   : > { %v665_v31 = vsel %vm659_vm5, %v634_v21, %v630_v13  ;;  %v660_v0 = vsel %vm659_vm5, %v618_v6, %v614_v43 }
 0x128   : > { %v588_v7 = vpop.xlane.xlu1 %587 }
 0x129   : > { %v580_v45 = vpop.xlane.xlu0 %579  ;;  %v638_v52 = vrot.slane %v588_v7, %v1228_v3 }
 0x12a   : > { %v622_v47 = vrot.slane %v580_v45, %v1228_v3 }
 0x12b   : > { %v666_v42 = vsel %vm661_vm4, %v638_v52, %v665_v31 }
 0x12c   : > { %v590_v56 = vpop.xlane.xlu1 %589  ;;  %v662_v44 = vsel %vm661_vm4, %v622_v47, %v660_v0 }
 0x12d   : > { %v642_v14 = vrot.slane %v590_v56, %v1228_v3 }
 0x12e   : > { %v582_v57 = vpop.xlane.xlu0 %581 }
 0x12f   : > { %v626_v4 = vrot.slane %v582_v57, %v1228_v3  ;;  %v667_v63 = vsel %vm663_vm6, %v642_v14, %v666_v42 }
 0x130   : > { %v678_v58 = vsel %vm674_vm7, %v667_v63, 0.0  ;;  %v598_v37 = vpop.xlane.xlu1 %597 }
 0x131   : > { %v664_v54 = vsel %vm663_vm6, %v626_v4, %v662_v44  ;;  %679 = vadd.xlane.f32.xlu1 %v678_v58  ;;  %v658_v49 = vrot.slane %v598_v37, %v1228_v3 }
 0x132   : > { %v596_v61 = vpop.xlane.xlu0 %595  ;;  %v675_v59 = vsel %vm674_vm7, %v664_v54, 0.0 }
 0x133   : > { %v654_v46 = vrot.slane %v596_v61, %v1228_v3  ;;  %676 = vadd.xlane.f32.xlu0 %v675_v59 }
 0x135   : > { %v669_v39 = vsel %vm661_vm4, %v654_v46, %v668_v8 }
 0x136   : > { %v670_v9 = vsel %vm663_vm6, %v658_v49, %v669_v39 }
 0x137   : > { %v681_v48 = vsel %vm674_vm7, %v670_v9, 0.0 }
 0x138   : > { %682 = vadd.xlane.f32.xlu0 %v681_v48 }
 0x1be   : > { %v680_v11 = vpop.xlane.xlu1 %679 }
 0x1bf   : > { %v694_v17 = vrot.slane %v680_v11, %v1228_v3 }
 0x1c0   : > { %v677_v10 = vpop.xlane.xlu0 %676 }
 0x1c1   : > { %v690_v41 = vrot.slane %v677_v10, %v1228_v3 }
 0x1c3   : > { %v699_v19 = vsel %vm659_vm5, %v694_v17, %v690_v41 }
 0x1c5   : > { %v683_v12 = vpop.xlane.xlu0 %682 }
 0x1c6   : > { %v698_v16 = vrot.slane %v683_v12, %v1228_v3 }
 0x1c8   : > { %v700_v23 = vsel %vm661_vm4, %v698_v16, %v699_v19 }
 0x1c9   : > { %703 = vst.msk [vmem:[%s218_s8] sm:$0x7] %vm702_vm8, %v700_v23 }
 0x1ca PF: > { %s18_s14 = sadd.s32 1, %s1057_s14   ;;  %s1549_s9 = smov %s1041_s10 }
 0x1cb   : > { %p15_p9 = scmp.ge.s32.totalorder %s18_s14, 4   ;;  %s1550_s10 = smov %s1045_s11 }
 0x1cc   : > { %s1551_s11 = smov %s1128_s21  ;;  %s1552_s12 = smov %s1053_s13 }
 0x1cd   : > { %s1553_s13 = smov %s1555_s16  ;;  %17 = sbr.rel (!%p15_p9) target bundleno = 6 (0x6), region = 100 }
 0x1d4   :  { %723 = vsyncpa [#allocation4], 1 }
 0x1d5   :  { %725 = vsyncpa [#allocation4 + $0x1], 1 }
 0x1d6   :  { %726 = vsyncpa [#allocation6], 1 }
 0x1d7   :  { %728 = vsyncpa [#allocation6 + $0x1], 1 }

</bundles_post_ra>
